<compile_context>
chip_gen: v7x
topology: tpu7x:2x2x1
jax: 0.10.0
libtpu: 0.0.40
codegen_flags: <defaults>
</compile_context>

<pallas_src>
import functools
import math

import jax
import jax.numpy as jnp
from jax import lax
from jax.experimental import pallas as pl
from jax.experimental.pallas import tpu as pltpu


def _group_norm_kernel(x_ref, gamma_ref, beta_ref, o_ref, *, eps, inv_d, reps):
    # x_ref / o_ref blocks: (Rb, D); gamma_ref / beta_ref blocks: (P, D),
    # with Rb == reps * P (group- and sublane-aligned).
    x = x_ref[...]                                            # native dtype

    # Pass 1: mean (always accumulate in f32).
    s = jnp.sum(x, axis=-1, keepdims=True, dtype=jnp.float32)  # (Rb, 1)
    mean = s * inv_d

    # Pass 2: centered sum of squares (two-pass variance, biased like torch).
    xc = x.astype(jnp.float32) - mean                          # (Rb, D) f32
    var = jnp.sum(xc * xc, axis=-1, keepdims=True) * inv_d     # (Rb, 1) >= 0
    inv = lax.rsqrt(var + eps)                                 # (Rb, 1)

    # Normalize, then narrow to the input dtype before the affine (bf16 VALU
    # on v6e/v7x; no-op for f32 inputs).
    y = (xc * inv).astype(x.dtype)                             # (Rb, D)

    gamma = gamma_ref[...]                                     # (P, D) resident
    beta = beta_ref[...]
    if reps > 1:
        p, d = gamma.shape
        # Free sublane-split reshape (P is a multiple of the sublane packing),
        # broadcast params over the leading `reps` axis.
        y = (y.reshape(reps, p, d) * gamma + beta).reshape(reps * p, d)
    else:
        y = y * gamma + beta
    o_ref[...] = y.astype(o_ref.dtype)


def _tpu_vmem_bytes():
    """Physical VMEM per TensorCore; conservative (v7x) fallback if unknown."""
    try:
        cap = getattr(pltpu.get_tpu_info(), "vmem_capacity_bytes", None)
        if cap:
            return int(cap)
    except Exception:
        pass
    return 64 * 1024 * 1024


def _choose_rows_per_block(R, P, D, itemsize, target_block_bytes, *, min_blocks=4):
    """Rows per block: a multiple of P near the byte target.

    Prefers >= min_blocks blocks (so double-buffering overlaps DMA with
    compute) and an even block count (balances v7x's two TensorCores).
    Partial last blocks are fine: rows are independent.
    """
    if P >= R:
        return R                                   # tiny problem: one full block
    bytes_per_row = max(1, D * itemsize)
    budget = max(P, (target_block_bytes // bytes_per_row) // P * P)
    cap = max(P, (R // min_blocks) // P * P)       # aim for >= min_blocks blocks
    rb0 = max(P, min(budget, cap))
    best = rb0
    for j in range(min(8, rb0 // P)):              # best-effort even block count
        rb = rb0 - j * P
        nb = -(-R // rb)
        if nb % 2 == 0:
            best = rb
            break
    return best


def group_norm(x, gamma, beta, *, n_groups, eps=1e-5,
               target_block_bytes=None, vmem_limit_bytes=None):
    """GroupNorm forward.  x: (N, C, L); gamma/beta: (C,) or None (affine=False)."""
    N, C, L = x.shape
    assert C % n_groups == 0
    G = n_groups
    cpg = C // G
    D = cpg * L                                    # elements per group (lane axis)
    R = N * G                                      # one row per (batch, group)

    if gamma is None:
        gamma = jnp.ones((C,), dtype=x.dtype)
    if beta is None:
        beta = jnp.zeros((C,), dtype=x.dtype)

    x2 = x.reshape(R, D)                           # contiguous (free) reshape

    itemsize = jnp.dtype(x.dtype).itemsize
    sub = max(8, 32 // itemsize)                   # sublane packing: 8 f32 / 16 bf16

    # Row period for the compact affine tile: group-aligned AND sublane-aligned.
    P = (G * sub) // math.gcd(G, sub)              # lcm(G, sub)
    if P >= R:
        # Tiny-R fallback: single full-array block (legal regardless of R % 8).
        # TODO(synk): dedupe param rows here for tiny-N / huge-D inputs.
        P = R

    # Per-generation VMEM budgeting.
    vmem_cap = _tpu_vmem_bytes()
    if vmem_limit_bytes is None:
        vmem_limit_bytes = min(vmem_cap * 3 // 4, 96 * 1024 * 1024)   # 48 MiB v7x / 96 MiB v5e-v6e
    if target_block_bytes is None:
        # ~4 MiB blocks on v7x, ~8 MiB on v5e/v6e; leaves room for the f32
        # centered temp plus double-buffered in/out blocks.
        target_block_bytes = max(512 * 1024,
                                 min(vmem_limit_bytes // 12, 16 * 1024 * 1024))

    Rb = _choose_rows_per_block(R, P, D, itemsize, target_block_bytes)
    reps = Rb // P
    n_blocks = -(-R // Rb)                         # partial last block is allowed

    # Compact lane-dense params: gamma[c] repeated L times along the row; rows
    # cycle through the G groups, tiled to one period P.  (Cacheable at init.)
    param_dtype = x.dtype
    gamma_rows = jnp.broadcast_to(
        gamma.astype(param_dtype).reshape(G, cpg, 1), (G, cpg, L)).reshape(G, D)
    beta_rows = jnp.broadcast_to(
        beta.astype(param_dtype).reshape(G, cpg, 1), (G, cpg, L)).reshape(G, D)
    if P // G > 1:
        gamma_rows = jnp.tile(gamma_rows, (P // G, 1))
        beta_rows = jnp.tile(beta_rows, (P // G, 1))

    kernel = functools.partial(_group_norm_kernel,
                               eps=float(eps), inv_d=1.0 / D, reps=int(reps))

    out2 = pl.pallas_call(
        kernel,
        out_shape=jax.ShapeDtypeStruct((R, D), x.dtype),
        grid_spec=pltpu.PrefetchScalarGridSpec(
            num_scalar_prefetch=0,
            grid=(n_blocks,),
            in_specs=[
                pl.BlockSpec((Rb, D), lambda i: (i, 0)),
                # Constant index_map -> fetched once, stays resident in VMEM.
                pl.BlockSpec((P, D), lambda i: (0, 0)),
                pl.BlockSpec((P, D), lambda i: (0, 0)),
            ],
            out_specs=pl.BlockSpec((Rb, D), lambda i: (i, 0)),
        ),
        compiler_params=pltpu.CompilerParams(
            dimension_semantics=("parallel",),
            vmem_limit_bytes=int(vmem_limit_bytes),
        ),
    )(x2, gamma_rows, beta_rows)

    return out2.reshape(N, C, L)


def _group_norm_ref(x, gamma, beta, *, n_groups, eps=1e-5):
    N, C, L = x.shape
    cpg = C // n_groups
    xg = x.reshape(N, n_groups, cpg, L).astype(jnp.float32)
    mean = jnp.mean(xg, axis=(2, 3), keepdims=True)
    var = jnp.mean((xg - mean) ** 2, axis=(2, 3), keepdims=True)
    y = ((xg - mean) / jnp.sqrt(var + eps)).reshape(N, C, L)
    y = y * gamma.astype(jnp.float32).reshape(1, -1, 1) \
        + beta.astype(jnp.float32).reshape(1, -1, 1)
    return y.astype(x.dtype)


if __name__ == "__main__":
    def run_case(N, C, L, n_groups, key, *, dtype=jnp.float32,
                 target_block_bytes=None, atol=1e-4, rtol=1e-4):
        kx, kg, kb = jax.random.split(key, 3)
        x = (jax.random.normal(kx, (N, C, L), dtype=jnp.float32) * 1.5 + 0.5
             ).astype(dtype)
        gamma = 1.0 + 0.1 * jax.random.normal(kg, (C,), dtype=jnp.float32)
        beta = 0.1 * jax.random.normal(kb, (C,), dtype=jnp.float32)

        out = group_norm(x, gamma, beta, n_groups=n_groups, eps=1e-5,
                         target_block_bytes=target_block_bytes)
        out = jax.block_until_ready(out)
        assert out.shape == (N, C, L) and out.dtype == x.dtype

        ref = _group_norm_ref(x, gamma, beta, n_groups=n_groups, eps=1e-5)
        o32 = out.astype(jnp.float32)
        r32 = ref.astype(jnp.float32)
        err = float(jnp.max(jnp.abs(o32 - r32)))
        assert jnp.allclose(o32, r32, atol=atol, rtol=rtol), err

    key = jax.random.PRNGKey(0)
    k1, k2, k3, k4, k5 = jax.random.split(key, 5)

    # 1) Typical small case: tiny-R fallback, single lane-dense block (grid=1).
    run_case(2, 8, 256, 2, k1)
    # 2) Multi-step grid (small block budget): exercises P-aligned row tiling,
    #    resident compact gamma/beta, and the even-block-count policy.
    run_case(8, 16, 128, 4, k2, target_block_bytes=16 * 1024)
    # 3) Odd, non-(8,128)-aligned shapes: full-array block fallback.
    run_case(3, 9, 24, 3, k3)
    # 4) Partial last block (R=20, Rb=8 -> 3 blocks, tail rows dropped).
    run_case(5, 16, 128, 4, k4, target_block_bytes=16 * 1024)
    # 5) bf16 inputs: native-dtype loads, f32 accumulation, bf16 affine.
    run_case(8, 32, 128, 4, k5, dtype=jnp.bfloat16,
             target_block_bytes=16 * 1024, atol=1e-1, rtol=1e-1)

    print("KERNEL_OK")
</pallas_src>

<mosaic_0001>
module attributes {stable_mosaic.version = 11 : i64} {
  func.func @_group_norm_kernel(%arg0: i32, %arg1: memref<4x1024xf32, #tpu.memory_space<vmem>>, %arg2: memref<4x1024xf32, #tpu.memory_space<vmem>>, %arg3: memref<4x1024xf32, #tpu.memory_space<vmem>>, %arg4: memref<4x1024xf32, #tpu.memory_space<vmem>>) attributes {dimension_semantics = [#tpu.dimension_semantics<parallel>], iteration_bounds = array<i64: 1>, scalar_prefetch = 0 : i64, scratch_operands = 0 : i64, tpu.core_type = #tpu.core_type<tc>, window_params = [{transform_indices = @transform_0, window_bounds = array<i64: 4, 1024>}, {pipeline_mode = #tpu.pipeline_mode<synchronous>, transform_indices = @transform_1, window_bounds = array<i64: 4, 1024>}, {pipeline_mode = #tpu.pipeline_mode<synchronous>, transform_indices = @transform_2, window_bounds = array<i64: 4, 1024>}, {transform_indices = @transform_3, window_bounds = array<i64: 4, 1024>}]} {
    %c0 = arith.constant 0 : index
    %c0_0 = arith.constant 0 : index
    %0 = vector.load %arg1[%c0, %c0_0] : memref<4x1024xf32, #tpu.memory_space<vmem>>, vector<4x1024xf32>
    %cst = arith.constant dense<0.000000e+00> : vector<4xf32>
    %1 = vector.multi_reduction <add>, %0, %cst [1] : vector<4x1024xf32> to vector<4xf32>
    %2 = vector.shape_cast %1 : vector<4xf32> to vector<4x1xf32>
    %cst_1 = arith.constant 9.765625E-4 : f32
    %3 = vector.broadcast %cst_1 : f32 to vector<4x1xf32>
    %4 = arith.mulf %2, %3 : vector<4x1xf32>
    %5 = vector.broadcast %4 : vector<4x1xf32> to vector<4x1024xf32>
    %6 = arith.subf %0, %5 : vector<4x1024xf32>
    %7 = arith.mulf %6, %6 : vector<4x1024xf32>
    %cst_2 = arith.constant dense<0.000000e+00> : vector<4xf32>
    %8 = vector.multi_reduction <add>, %7, %cst_2 [1] : vector<4x1024xf32> to vector<4xf32>
    %9 = vector.shape_cast %8 : vector<4xf32> to vector<4x1xf32>
    %cst_3 = arith.constant 9.765625E-4 : f32
    %10 = vector.broadcast %cst_3 : f32 to vector<4x1xf32>
    %11 = arith.mulf %9, %10 : vector<4x1xf32>
    %cst_4 = arith.constant 9.99999974E-6 : f32
    %12 = vector.broadcast %cst_4 : f32 to vector<4x1xf32>
    %13 = arith.addf %11, %12 : vector<4x1xf32>
    %14 = math.rsqrt %13 : vector<4x1xf32>
    %15 = vector.broadcast %14 : vector<4x1xf32> to vector<4x1024xf32>
    %16 = arith.mulf %6, %15 : vector<4x1024xf32>
    %c0_5 = arith.constant 0 : index
    %c0_6 = arith.constant 0 : index
    %17 = vector.load %arg2[%c0_5, %c0_6] : memref<4x1024xf32, #tpu.memory_space<vmem>>, vector<4x1024xf32>
    %c0_7 = arith.constant 0 : index
    %c0_8 = arith.constant 0 : index
    %18 = vector.load %arg3[%c0_7, %c0_8] : memref<4x1024xf32, #tpu.memory_space<vmem>>, vector<4x1024xf32>
    %19 = arith.mulf %16, %17 : vector<4x1024xf32>
    %20 = arith.addf %19, %18 : vector<4x1024xf32>
    %c0_9 = arith.constant 0 : index
    %c0_10 = arith.constant 0 : index
    %21 = vector.load %arg4[%c0_9, %c0_10] : memref<4x1024xf32, #tpu.memory_space<vmem>>, vector<4x1024xf32>
    tpu.vector_store %arg4[%c0_9, %c0_10], %20 {strides = array<i32>} : memref<4x1024xf32, #tpu.memory_space<vmem>>, vector<4x1024xf32>,
    return
  }
  func.func @transform_0(%arg0: i32) -> (i32, i32) {
    %c0_i32 = arith.constant 0 : i32
    %c0_i32_0 = arith.constant 0 : i32
    return %arg0, %c0_i32 : i32, i32
  }
  func.func @transform_1(%arg0: i32) -> (i32, i32) {
    %c0_i32 = arith.constant 0 : i32
    %c0_i32_0 = arith.constant 0 : i32
    %c0_i32_1 = arith.constant 0 : i32
    return %c0_i32, %c0_i32_0 : i32, i32
  }
  func.func @transform_2(%arg0: i32) -> (i32, i32) {
    %c0_i32 = arith.constant 0 : i32
    %c0_i32_0 = arith.constant 0 : i32
    %c0_i32_1 = arith.constant 0 : i32
    return %c0_i32, %c0_i32_0 : i32, i32
  }
  func.func @transform_3(%arg0: i32) -> (i32, i32) {
    %c0_i32 = arith.constant 0 : i32
    %c0_i32_0 = arith.constant 0 : i32
    return %arg0, %c0_i32 : i32, i32
  }
}

</mosaic_0001>

<bundles_post_ra>
// kernel: tpu_custom_call.1
= control target key start
LH: loop header
LB: loop body
LE: loop exit
PB: predicated region body
PF: predicated region fallthrough
CT: control target
= control target key end

     0   :  { %8 = vsyncpa [#allocation3], 0  ;;  %s377_s0 = inlined_call_operand.hbm [shape: f32[4,1024], index: 0, kind: input, shape index: {}]   ;;  %s378_s1 = inlined_call_operand.hbm [shape: f32[4,1024], index: 1, kind: input, shape index: {}]   ;;  %s379_s2 = inlined_call_operand.hbm [shape: f32[4,1024], index: 2, kind: input, shape index: {}]   ;;  %s380_s3 = inlined_call_operand.hbm [shape: f32[4,1024], index: 3, kind: output, shape index: {}]  }
   0x1   :  { %9 = vsyncpa [#allocation6], 0 }
   0x2   :  { %10 = vsyncpa [#allocation4], 0  ;;  %s288_s12 = smov [#allocation5]   ;;  %s289_s14 = smov [#allocation2]  }
   0x3   :  { %s27_s13 = sshll.u32 %s288_s12, 4  ;;  %s17_s15 = sshll.u32 %s289_s14, 4  ;;  %s28_s13 = int_to_ptr.vmem [resolvable:$true] %s27_s13  ;;  %s18_s15 = int_to_ptr.vmem [resolvable:$true] %s17_s15 }
   0x4   :  { %s194_s18 = scalar_lea.hbm %s378_s1, 512 }
   0x5   :  { %p195_p0 = scmp.ne.s32.totalorder %s378_s1, %s194_s18  ;;  %p198_p1 = scmp.lt.u32.totalorder %s194_s18, %s378_s1 }
   0x7   :  { %p200_p2 = pnand %p198_p1, %p195_p0 }
   0x9   :  { %203 = shalt.err (!%p200_p2)
}
   0xa   :  { %s204_s23 = scalar_lea.vmem %s28_s13, 512  ;;  %p209_p4 = scmp.lt.s32.totalorder %s28_s13, %s28_s13 }
   0xb   :  { %p205_p3 = scmp.ne.s32.totalorder %s28_s13, %s204_s23  ;;  %p210_p5 = scmp.lt.s32.totalorder %s204_s23, %s204_s23 }
   0xd   :  { %p211_p6 = por %p210_p5, %p209_p4 }
   0xf   :  { %p212_p7 = pnand %p211_p6, %p205_p3 }
  0x11   :  { %215 = shalt.err (!%p212_p7)
}
  0x12   :  { %30 = dma.hbm_to_vmem [thread:$0]  %s378_s1, 512, %s28_s13, [#allocation6]  }
  0x13   :  { %s216_s28 = scalar_lea.hbm %s377_s0, 512 }
  0x14   :  { %p217_p8 = scmp.ne.s32.totalorder %s377_s0, %s216_s28  ;;  %p220_p9 = scmp.lt.u32.totalorder %s216_s28, %s377_s0 }
  0x16   :  { %p222_p10 = pnand %p220_p9, %p217_p8 }
  0x18   :  { %225 = shalt.err (!%p222_p10)
}
  0x19   :  { %s226_s6 = scalar_lea.vmem %s18_s15, 512  ;;  %p231_p12 = scmp.lt.s32.totalorder %s18_s15, %s18_s15 }
  0x1a   :  { %p227_p11 = scmp.ne.s32.totalorder %s18_s15, %s226_s6  ;;  %p232_p13 = scmp.lt.s32.totalorder %s226_s6, %s226_s6 }
  0x1c   :  { %p233_p0 = por %p232_p13, %p231_p12 }
  0x1e   :  { %p234_p1 = pnand %p233_p0, %p227_p11 }
  0x20   :  { %237 = shalt.err (!%p234_p1)
}
  0x21   :  { %20 = dma.hbm_to_vmem [thread:$0]  %s377_s0, 512, %s18_s15, [#allocation3]  }
  0x22   :  { %s290_s8 = smov [#allocation7]   ;;  %s238_s12 = scalar_lea.hbm %s379_s2, 512 }
  0x23   :  { %s37_s9 = sshll.u32 %s290_s8, 4  ;;  %p239_p2 = scmp.ne.s32.totalorder %s379_s2, %s238_s12  ;;  %s38_s9 = int_to_ptr.vmem [resolvable:$true] %s37_s9 }
  0x24   :  { %p242_p3 = scmp.lt.u32.totalorder %s238_s12, %s379_s2 }
  0x26   :  { %p244_p4 = pnand %p242_p3, %p239_p2 }
  0x28   :  { %247 = shalt.err (!%p244_p4)
}
  0x29   :  { %s248_s18 = scalar_lea.vmem %s38_s9, 512  ;;  %p253_p6 = scmp.lt.s32.totalorder %s38_s9, %s38_s9 }
  0x2a   :  { %p249_p5 = scmp.ne.s32.totalorder %s38_s9, %s248_s18  ;;  %p254_p7 = scmp.lt.s32.totalorder %s248_s18, %s248_s18 }
  0x2c   :  { %p255_p8 = por %p254_p7, %p253_p6 }
  0x2e   :  { %p256_p9 = pnand %p255_p8, %p249_p5 }
  0x30   :  { %259 = shalt.err (!%p256_p9)
}
  0x31   :  { %40 = dma.hbm_to_vmem [thread:$0]  %s379_s2, 512, %s38_s9, [#allocation6]  }
  0x32   :  { %282 = dma.done.wait [#allocation3], 512  }
  0x33   :  { %283 = vsyncadd [#allocation3], 4294966784 }
  0x34   :  { %284 = dma.done.wait [#allocation6], 1024  }
  0x35   :  { %285 = vsyncadd [#allocation6], 4294966272  ;;  %vm66_vm0 = vcmask 1043456   ;;  %v50_v0 = vld [vmem:[#allocation2] sm:$0xff]  ;;  %v51_v1 = vld [vmem:[#allocation2 + $0x8] sm:$0xff]  ;;  %v89_v25 = vlaneseq  ;;  %s292_s2 = smov [#allocation8]  }
  0x36   :  { %v58_v2 = vcombine.high %v50_v0, %v50_v0  ;;  %v59_v3 = vcombine.high %v51_v1, %v51_v1  ;;  %v67_v4 = vsel %vm66_vm0, %v50_v0, 0.0  ;;  %v52_v5 = vld [vmem:[#allocation2 + $0x10] sm:$0xff]  ;;  %v70_v7 = vsel %vm66_vm0, %v51_v1, 0.0  ;;  %v53_v11 = vld [vmem:[#allocation2 + $0x18] sm:$0xff]  ;;  %s173_s19 = sshll.u32 %s292_s2, 4  ;;  %s174_s19 = int_to_ptr.vmem [resolvable:$true] %s173_s19 }
  0x37   :  { %v60_v9 = vcombine.high %v52_v5, %v52_v5  ;;  %v74_v13 = vsel %vm66_vm0, %v52_v5, 0.0  ;;  %v61_v15 = vcombine.high %v53_v11, %v53_v11  ;;  %v78_v18 = vsel %vm66_vm0, %v53_v11, 0.0  ;;  %s260_s20 = scalar_lea.vmem %s174_s19, 512  ;;  %p265_p11 = scmp.lt.s32.totalorder %s174_s19, %s174_s19 }
  0x38   :  { %v68_v6 = vsel %vm66_vm0, %v58_v2, 0.0  ;;  %v72_v10 = vsel %vm66_vm0, %v59_v3, 0.0  ;;  %v291_v23 = vmov 839922192   ;;  %v90_v27 = vshrl.u32 %v89_v25, 7  ;;  %v149_v2 = vld [vmem:[#allocation5 + $0x10] sm:$0xff]  ;;  %p261_p10 = scmp.ne.s32.totalorder %s174_s19, %s260_s20  ;;  %p266_p12 = scmp.lt.s32.totalorder %s260_s20, %s260_s20 }
  0x39   :  { %v69_v8 = vadd.f32 %v68_v6, %v67_v4  ;;  %v76_v16 = vsel %vm66_vm0, %v60_v9, 0.0  ;;  %v80_v20 = vsel %vm66_vm0, %v61_v15, 0.0  ;;  %v87_v24 = vunpack.c.l.s4 %v291_v23  ;;  %v150_v3 = vld [vmem:[#allocation5 + $0x18] sm:$0xff]  ;;  %v152_v9 = vld [vmem:[#allocation7 + $0x8] sm:$0xff] }
  0x3a   :  { %p267_p13 = por %p266_p12, %p265_p11 }
  0x3b   :  { %v71_v12 = vadd.f32 %v70_v7, %v69_v8  ;;  %v88_v26 = vunpack.c.0.s8 %v87_v24  ;;  %v151_v8 = vld [vmem:[#allocation7] sm:$0xff] }
  0x3c   :  { %p268_p0 = pnand %p267_p13, %p261_p10 }
  0x3d   :  { %v73_v14 = vadd.f32 %v72_v10, %v71_v12  ;;  %v91_v28 = vsub.s32 %v88_v26, %v90_v27  ;;  %v153_v10 = vld [vmem:[#allocation7 + $0x10] sm:$0xff] }
  0x3f   :  { %v75_v17 = vadd.f32 %v74_v13, %v73_v14 }
  0x41   :  { %v77_v19 = vadd.f32 %v76_v16, %v75_v17 }
  0x43   :  { %v79_v21 = vadd.f32 %v78_v18, %v77_v19 }
  0x45   :  { %v81_v22 = vadd.f32 %v80_v20, %v79_v21 }
  0x47   :  { %82 = vadd.xlane.f32.xlu0 %v81_v22 }
  0xd4   :  { %v83_v29 = vpop.xlane.xlu0 %82 }
  0xd5   :  { %v84_v30 = vmul.f32 0.0009765625, %v83_v29 }
  0xd7   :  { %v92_v31 = vrot.slane %v84_v30, %v91_v28 }
  0xd9   :  { %v94_v32 = vsub.f32 %v50_v0, %v92_v31  ;;  %v95_v33 = vsub.f32 %v51_v1, %v92_v31  ;;  %v96_v34 = vsub.f32 %v52_v5, %v92_v31  ;;  %v97_v38 = vsub.f32 %v53_v11, %v92_v31  ;;  %v147_v0 = vld [vmem:[#allocation5] sm:$0xff]  ;;  %v148_v1 = vld [vmem:[#allocation5 + $0x8] sm:$0xff]  ;;  %v154_v11 = vld [vmem:[#allocation7 + $0x18] sm:$0xff] }
  0xdb   :  { %v98_v35 = vmul.f32 %v94_v32, %v94_v32  ;;  %v99_v36 = vmul.f32 %v95_v33, %v95_v33  ;;  %v100_v39 = vmul.f32 %v96_v34, %v96_v34  ;;  %v101_v46 = vmul.f32 %v97_v38, %v97_v38 }
  0xdd   :  { %v106_v37 = vcombine.high %v98_v35, %v98_v35  ;;  %v107_v40 = vcombine.high %v99_v36, %v99_v36  ;;  %v114_v41 = vsel %vm66_vm0, %v98_v35, 0.0  ;;  %v117_v44 = vsel %vm66_vm0, %v99_v36, 0.0 }
  0xde   :  { %v108_v47 = vcombine.high %v100_v39, %v100_v39  ;;  %v121_v50 = vsel %vm66_vm0, %v100_v39, 0.0  ;;  %v109_v52 = vcombine.high %v101_v46, %v101_v46  ;;  %v125_v55 = vsel %vm66_vm0, %v101_v46, 0.0 }
  0xdf   :  { %v115_v42 = vsel %vm66_vm0, %v106_v37, 0.0  ;;  %v119_v48 = vsel %vm66_vm0, %v107_v40, 0.0 }
  0xe0   :  { %v116_v43 = vadd.f32 %v115_v42, %v114_v41  ;;  %v123_v53 = vsel %vm66_vm0, %v108_v47, 0.0  ;;  %v127_v57 = vsel %vm66_vm0, %v109_v52, 0.0 }
  0xe2   :  { %v118_v45 = vadd.f32 %v117_v44, %v116_v43 }
  0xe4   :  { %v120_v49 = vadd.f32 %v119_v48, %v118_v45 }
  0xe6   :  { %v122_v51 = vadd.f32 %v121_v50, %v120_v49 }
  0xe8   :  { %v124_v54 = vadd.f32 %v123_v53, %v122_v51 }
  0xea   :  { %v126_v56 = vadd.f32 %v125_v55, %v124_v54 }
  0xec   :  { %v128_v58 = vadd.f32 %v127_v57, %v126_v56 }
  0xee   :  { %129 = vadd.xlane.f32.xlu0 %v128_v58 }
 0x17b   :  { %v130_v59 = vpop.xlane.xlu0 %129 }
 0x17c   :  { %v131_v60 = vmul.f32 0.0009765625, %v130_v59 }
 0x17e   :  { %v132_v61 = vadd.f32 1e-05, %v131_v60 }
 0x180   :  { %192 = vrsqrt.f32 %v132_v61 }
 0x18a   :  { %v193_v62 = vpop.eup %192 }
 0x18b   :  { %v141_v63 = vrot.slane %v193_v62, %v91_v28 }
 0x18d   :  { %v143_v4 = vmul.f32 %v141_v63, %v94_v32  ;;  %v144_v5 = vmul.f32 %v141_v63, %v95_v33  ;;  %v145_v6 = vmul.f32 %v141_v63, %v96_v34  ;;  %v146_v7 = vmul.f32 %v141_v63, %v97_v38 }
 0x18f   :  { %v155_v12 = vmul.f32 %v147_v0, %v143_v4  ;;  %v156_v13 = vmul.f32 %v148_v1, %v144_v5  ;;  %v157_v14 = vmul.f32 %v149_v2, %v145_v6  ;;  %v158_v15 = vmul.f32 %v150_v3, %v146_v7 }
 0x191   :  { %v159_v16 = vadd.f32 %v155_v12, %v151_v8  ;;  %v160_v17 = vadd.f32 %v156_v13, %v152_v9  ;;  %v161_v18 = vadd.f32 %v157_v14, %v153_v10  ;;  %v162_v19 = vadd.f32 %v158_v15, %v154_v11 }
 0x193   :  { %163 = vst [vmem:[#allocation8] sm:$0xff] %v159_v16  ;;  %164 = vst [vmem:[#allocation8 + $0x8] sm:$0xff] %v160_v17 }
 0x194   :  { %165 = vst [vmem:[#allocation8 + $0x10] sm:$0xff] %v161_v18  ;;  %166 = vst [vmem:[#allocation8 + $0x18] sm:$0xff] %v162_v19 }
 0x195   :  { %271 = shalt.err (!%p268_p0)
}
 0x196   :  { %s272_s23 = scalar_lea.hbm %s380_s3, 512 }
 0x197   :  { %p273_p1 = scmp.ne.s32.totalorder %s380_s3, %s272_s23  ;;  %p276_p2 = scmp.lt.u32.totalorder %s272_s23, %s380_s3 }
 0x199   :  { %p278_p3 = pnand %p276_p2, %p273_p1 }
 0x19b   :  { %281 = shalt.err (!%p278_p3)
}
 0x19c   :  { %176 = dma.vmem_to_hbm [thread:$0]  %s174_s19, 512, %s380_s3, [#allocation4]  }
 0x19d   :  { %286 = dma.done.wait [#allocation4], 512  }
 0x19e   :  { %287 = vsyncadd [#allocation4], 4294966784 }
 0x19f   :  { %180 = vsyncpa [#allocation3], 1 }
 0x1a0   :  { %181 = vsyncpa [#allocation6], 1 }
 0x1a1   :  { %182 = vsyncpa [#allocation4], 1 }

</bundles_post_ra>
